<compile_context>
chip_gen: v7x
topology: tpu7x:2x2x1
jax: 0.10.0
libtpu: 0.0.40
codegen_flags: <defaults>
</compile_context>

<pallas_src>
import functools

import jax
import jax.numpy as jnp
from jax.experimental import pallas as pl
from jax.experimental.pallas import tpu as pltpu


def _recurrent_tokenizer_kernel(x_ref, t_ref, w1_ref, b1_ref, w2_ref, b2_ref,
                                o_ref,
                                a_scratch, m_scratch, l_scratch, acc_scratch,
                                *, compute_dtype):
    h = pl.program_id(1)

    # Per-batch init (first HW chunk): compute a = linear1(t) once and reset
    # the online-softmax state.  t arrives in its HBM dtype (f32); the cast to
    # the MXU operand dtype happens here, hidden under the pipeline.
    @pl.when(h == 0)
    def _():
        a = jnp.dot(t_ref[...].astype(compute_dtype), w1_ref[...],
                    preferred_element_type=jnp.float32) + b1_ref[...]
        a_scratch[...] = a.astype(compute_dtype)
        m_scratch[...] = jnp.full_like(m_scratch, -jnp.inf)
        l_scratch[...] = jnp.zeros_like(l_scratch)
        acc_scratch[...] = jnp.zeros_like(acc_scratch)

    # b chunk = linear2(x chunk): (tile_hw, D_pad); f32 accumulation, fused
    # f32 bias epilogue.  Cast of x happens in-kernel (no wrapper HBM pass).
    b = jnp.dot(x_ref[...].astype(compute_dtype), w2_ref[...],
                preferred_element_type=jnp.float32) + b2_ref[...]
    b_lo = b.astype(compute_dtype)        # bound once; reused by both dots

    # Scores in (L, tile_hw) orientation, contracting D of both operands
    # directly (NT matmul -> MXU transpose_rhs; no explicit transpose).
    s = jax.lax.dot_general(
        a_scratch[...], b_lo,
        dimension_numbers=(((1,), (1,)), ((), ())),
        preferred_element_type=jnp.float32)

    # Flash-style online softmax over the pixel (HW) axis, all f32
    # (torch: softmax(dim=1) of the (N, HW, L) score tensor).
    m_prev = m_scratch[...]
    m_new = jnp.maximum(m_prev, jnp.max(s, axis=-1, keepdims=True))
    alpha = jnp.exp(m_prev - m_new)
    p = jnp.exp(s - m_new)
    l_scratch[...] = alpha * l_scratch[...] + jnp.sum(p, axis=-1, keepdims=True)
    acc_scratch[...] = alpha * acc_scratch[...] + jnp.dot(
        p.astype(compute_dtype), b_lo, preferred_element_type=jnp.float32)
    m_scratch[...] = m_new

    # Finalize on the last HW chunk: normalize (EUP approx reciprocal) and do
    # a single lane-dense store of the padded (L, D_pad) tile.
    @pl.when(h == pl.num_programs(1) - 1)
    def _():
        inv_l = pl.reciprocal(l_scratch[...], approx=True)
        o_ref[...] = (acc_scratch[...] * inv_l).astype(o_ref.dtype)


def _choose_hw_tile(hw, target=512):
    """Largest multiple-of-8 divisor of hw that is <= target.

    Falls back to the full extent if hw is not a multiple of 8 (full-dim
    blocks are always legal)."""
    if hw % 8 != 0:
        return hw
    t = min(target, hw)
    t -= t % 8
    while hw % t != 0:
        t -= 8
    return t


def recurrent_tokenizer(x, t, w1, b1, w2, b2, *, compute_dtype=jnp.bfloat16,
                        hw_tile=512):
    """x: (N, HW, C), t: (N, L, D); w1: (D, D), w2: (C, D) stored (in, out)."""
    N, HW, C = x.shape
    _, L, D = t.shape

    # Lane-dense padding of the token-channel axis: weights / biases only
    # (one-time, tiny).  Padded columns are zero so a[:, D:] = b[:, D:] = 0,
    # the D-contraction is unchanged and padded output columns are exact
    # zeros; the wrapper slices them off.  x and t are NOT touched.
    D_pad = -(-D // 128) * 128

    def pad_cols(w):
        return jnp.pad(w, ((0, 0), (0, D_pad - D))) if D_pad != D else w

    w1c = pad_cols(w1).astype(compute_dtype)
    w2c = pad_cols(w2).astype(compute_dtype)
    b1p = pad_cols(b1.reshape(1, D)).astype(jnp.float32)
    b2p = pad_cols(b2.reshape(1, D)).astype(jnp.float32)

    tile_hw = _choose_hw_tile(HW, hw_tile)
    num_hw = HW // tile_hw

    kernel = functools.partial(_recurrent_tokenizer_kernel,
                               compute_dtype=compute_dtype)

    out = pl.pallas_call(
        kernel,
        out_shape=jax.ShapeDtypeStruct((N, L, D_pad), jnp.float32),
        grid_spec=pltpu.PrefetchScalarGridSpec(
            num_scalar_prefetch=0,
            # batch (parallel, feeds both v7x TCs) x HW chunks (reduction,
            # last, arbitrary).
            grid=(N, num_hw),
            in_specs=[
                pl.BlockSpec((None, tile_hw, C), lambda n, h: (n, h, 0)),  # x chunk (streamed)
                pl.BlockSpec((None, L, D), lambda n, h: (n, 0, 0)),        # t (per-batch)
                pl.BlockSpec((D, D_pad), lambda n, h: (0, 0)),             # w1 (resident)
                pl.BlockSpec((1, D_pad), lambda n, h: (0, 0)),             # b1 (resident)
                pl.BlockSpec((C, D_pad), lambda n, h: (0, 0)),             # w2 (resident)
                pl.BlockSpec((1, D_pad), lambda n, h: (0, 0)),             # b2 (resident)
            ],
            out_specs=pl.BlockSpec((None, L, D_pad), lambda n, h: (n, 0, 0)),
            scratch_shapes=[
                pltpu.VMEM((L, D_pad), compute_dtype),   # a = linear1(t)
                pltpu.VMEM((L, 1), jnp.float32),         # online-softmax max
                pltpu.VMEM((L, 1), jnp.float32),         # online-softmax sum
                pltpu.VMEM((L, D_pad), jnp.float32),     # output accumulator
            ]),
        compiler_params=pltpu.CompilerParams(
            dimension_semantics=("parallel", "arbitrary"),
            # Explicit, generation-safe limit: working set (2x x-chunk
            # double-buffer + weights + scratch) is well under this on
            # v5e/v6e/v7x for tile_hw <= 512.
            vmem_limit_bytes=32 * 1024 * 1024),
    )(x, t, w1c, b1p, w2c, b2p)

    # TODO(synk): the module's self.cache1 / self.cache2 side-effect stores of
    # the raw scores and softmax probabilities are not reproduced.
    return out[..., :D] if D_pad != D else out


def reference(x, t, w1, b1, w2, b2, compute_dtype=jnp.float32):
    """Pure-JAX reference mirroring the PyTorch module's forward.

    With compute_dtype=bfloat16 it replicates the kernel's MXU-operand casts
    (f32 accumulation), giving a precision-matched reference.
    """
    dt = compute_dtype
    exact = jnp.dtype(dt) == jnp.dtype(jnp.float32)
    prec = jax.lax.Precision.HIGHEST if exact else None
    a = jnp.einsum("nld,de->nle", t.astype(dt), w1.astype(dt),
                   preferred_element_type=jnp.float32, precision=prec) + b1
    b = jnp.einsum("nhc,cd->nhd", x.astype(dt), w2.astype(dt),
                   preferred_element_type=jnp.float32, precision=prec) + b2
    s = jnp.einsum("nhd,nld->nhl", b.astype(dt), a.astype(dt),
                   preferred_element_type=jnp.float32, precision=prec)
    p = jax.nn.softmax(s, axis=1)                        # softmax over HW
    return jnp.einsum("nhl,nhd->nld", p.astype(dt), b.astype(dt),
                      preferred_element_type=jnp.float32, precision=prec)


def xavier_normal(key, fan_in, fan_out):
    std = jnp.sqrt(2.0 / (fan_in + fan_out))
    return std * jax.random.normal(key, (fan_in, fan_out), dtype=jnp.float32)


if __name__ == "__main__":
    # Small shapes consistent with the module's forward:
    # N=2 batch, HW=64 pixels, C=16 in_channels, L=8 tokens, D=32 token_channels
    N, HW, C, L, D = 2, 64, 16, 8, 32

    key = jax.random.PRNGKey(0)
    kx, kt, kw1, kb1, kw2, kb2 = jax.random.split(key, 6)

    x = jax.random.normal(kx, (N, HW, C), dtype=jnp.float32)
    t = jax.random.normal(kt, (N, L, D), dtype=jnp.float32)

    # Deterministic params (xavier-normal weights, small uniform biases),
    # stored as (in, out) so the kernel computes y = x @ W + b.
    w1 = xavier_normal(kw1, D, D)                                   # linear1: D -> D
    b1 = jax.random.uniform(kb1, (D,), jnp.float32, -0.1, 0.1)
    w2 = xavier_normal(kw2, C, D)                                   # linear2: C -> D
    b2 = jax.random.uniform(kb2, (D,), jnp.float32, -0.1, 0.1)

    # Fast path: bf16 MXU operands, f32 accumulation, online softmax over two
    # HW chunks (hw_tile=32 -> grid=(2, 2)), approx EUP reciprocal.
    out = recurrent_tokenizer(x, t, w1, b1, w2, b2, hw_tile=32)
    out = jax.block_until_ready(out)
    assert out.shape == (N, L, D)

    # Tight check vs. a precision-matched (bf16-operand) reference; residual
    # difference is the approx reciprocal (~2^-8 rel), per-chunk bf16 rounding
    # of p, and accumulation order of the online softmax.
    ref_bf16 = reference(x, t, w1, b1, w2, b2, compute_dtype=jnp.bfloat16)
    assert jnp.allclose(out, ref_bf16, atol=2e-2, rtol=2e-2), \
        "mismatch vs bf16-matched reference"

    # Loose check vs. true f32 semantics (bounds bf16 operand drift through
    # the softmax).
    ref_f32 = reference(x, t, w1, b1, w2, b2, compute_dtype=jnp.float32)
    assert jnp.allclose(out, ref_f32, atol=1e-1, rtol=1e-1), \
        "mismatch vs f32 reference (bf16 drift bound)"

    # Full-f32 kernel path: verifies the online-softmax / padding / NT-matmul
    # math itself to tight tolerance (only approx-recip + MXU precision differ).
    out_f32 = recurrent_tokenizer(x, t, w1, b1, w2, b2,
                                  compute_dtype=jnp.float32, hw_tile=32)
    out_f32 = jax.block_until_ready(out_f32)
    assert jnp.allclose(out_f32, ref_f32, atol=2e-2, rtol=2e-2), \
        "mismatch vs f32 reference (f32 kernel path)"

    print("KERNEL_OK")
</pallas_src>

<mosaic_0001>
module attributes {stable_mosaic.version = 11 : i64} {
  func.func @_recurrent_tokenizer_kernel(%arg0: i32, %arg1: i32, %arg2: memref<1x32x16xf32, #tpu.memory_space<vmem>>, %arg3: memref<1x8x32xf32, #tpu.memory_space<vmem>>, %arg4: memref<32x128xbf16, #tpu.memory_space<vmem>>, %arg5: memref<1x128xf32, #tpu.memory_space<vmem>>, %arg6: memref<16x128xbf16, #tpu.memory_space<vmem>>, %arg7: memref<1x128xf32, #tpu.memory_space<vmem>>, %arg8: memref<1x8x128xf32, #tpu.memory_space<vmem>>, %arg9: memref<8x128xbf16, #tpu.memory_space<vmem>>, %arg10: memref<8x1xf32, #tpu.memory_space<vmem>>, %arg11: memref<8x1xf32, #tpu.memory_space<vmem>>, %arg12: memref<8x128xf32, #tpu.memory_space<vmem>>) attributes {dimension_semantics = [#tpu.dimension_semantics<parallel>, #tpu.dimension_semantics<arbitrary>], iteration_bounds = array<i64: 2, 2>, scalar_prefetch = 0 : i64, scratch_operands = 4 : i64, tpu.core_type = #tpu.core_type<tc>, window_params = [{transform_indices = @transform_0, window_bounds = array<i64: 1, 32, 16>}, {transform_indices = @transform_1, window_bounds = array<i64: 1, 8, 32>}, {pipeline_mode = #tpu.pipeline_mode<synchronous>, transform_indices = @transform_2, window_bounds = array<i64: 32, 128>}, {pipeline_mode = #tpu.pipeline_mode<synchronous>, transform_indices = @transform_3, window_bounds = array<i64: 1, 128>}, {pipeline_mode = #tpu.pipeline_mode<synchronous>, transform_indices = @transform_4, window_bounds = array<i64: 16, 128>}, {pipeline_mode = #tpu.pipeline_mode<synchronous>, transform_indices = @transform_5, window_bounds = array<i64: 1, 128>}, {transform_indices = @transform_6, window_bounds = array<i64: 1, 8, 128>}]} {
    %c0_i32 = arith.constant 0 : i32
    %0 = arith.cmpi eq, %arg1, %c0_i32 : i32
    %1 = arith.extui %0 : i1 to i32
    %c0_i32_0 = arith.constant 0 : i32
    %2 = arith.cmpi ne, %1, %c0_i32_0 : i32
    scf.if %2 {
      %c0_26 = arith.constant 0 : index
      %c0_27 = arith.constant 0 : index
      %c0_28 = arith.constant 0 : index
      %40 = vector.load %arg3[%c0_26, %c0_27, %c0_28] : memref<1x8x32xf32, #tpu.memory_space<vmem>>, vector<1x8x32xf32>
      %41 = vector.shape_cast %40 : vector<1x8x32xf32> to vector<8x32xf32>
      %42 = arith.truncf %41 : vector<8x32xf32> to vector<8x32xbf16>
      %c0_29 = arith.constant 0 : index
      %c0_30 = arith.constant 0 : index
      %43 = vector.load %arg4[%c0_29, %c0_30] : memref<32x128xbf16, #tpu.memory_space<vmem>>, vector<32x128xbf16>
      %cst_31 = arith.constant dense<0.000000e+00> : vector<8x128xf32>
      %44 = tpu.matmul %42, %43, %cst_31 {dimension_numbers = #tpu.dot_dimension_numbers<[1], [0], [0], [1], [0, 0, 1, 1], [], []>} : vector<8x32xbf16>, vector<32x128xbf16>, vector<8x128xf32> -> vector<8x128xf32>
      %c0_32 = arith.constant 0 : index
      %c0_33 = arith.constant 0 : index
      %45 = vector.load %arg5[%c0_32, %c0_33] : memref<1x128xf32, #tpu.memory_space<vmem>>, vector<1x128xf32>
      %46 = vector.broadcast %45 : vector<1x128xf32> to vector<8x128xf32>
      %47 = arith.addf %44, %46 : vector<8x128xf32>
      %48 = arith.truncf %47 : vector<8x128xf32> to vector<8x128xbf16>
      %c0_34 = arith.constant 0 : index
      %c0_35 = arith.constant 0 : index
      %49 = vector.load %arg9[%c0_34, %c0_35] : memref<8x128xbf16, #tpu.memory_space<vmem>>, vector<8x128xbf16>
      tpu.vector_store %arg9[%c0_34, %c0_35], %48 {strides = array<i32>} : memref<8x128xbf16, #tpu.memory_space<vmem>>, vector<8x128xbf16>,
      %cst_36 = arith.constant 0xFF800000 : f32
      %50 = vector.broadcast %cst_36 : f32 to vector<8x1xf32>
      %c0_37 = arith.constant 0 : index
      %c0_38 = arith.constant 0 : index
      %51 = vector.load %arg10[%c0_37, %c0_38] : memref<8x1xf32, #tpu.memory_space<vmem>>, vector<8x1xf32>
      tpu.vector_store %arg10[%c0_37, %c0_38], %50 {strides = array<i32>} : memref<8x1xf32, #tpu.memory_space<vmem>>, vector<8x1xf32>,
      %cst_39 = arith.constant 0.000000e+00 : f32
      %52 = vector.broadcast %cst_39 : f32 to vector<8x1xf32>
      %c0_40 = arith.constant 0 : index
      %c0_41 = arith.constant 0 : index
      %53 = vector.load %arg11[%c0_40, %c0_41] : memref<8x1xf32, #tpu.memory_space<vmem>>, vector<8x1xf32>
      tpu.vector_store %arg11[%c0_40, %c0_41], %52 {strides = array<i32>} : memref<8x1xf32, #tpu.memory_space<vmem>>, vector<8x1xf32>,
      %cst_42 = arith.constant 0.000000e+00 : f32
      %54 = vector.broadcast %cst_42 : f32 to vector<8x128xf32>
      %c0_43 = arith.constant 0 : index
      %c0_44 = arith.constant 0 : index
      %55 = vector.load %arg12[%c0_43, %c0_44] : memref<8x128xf32, #tpu.memory_space<vmem>>, vector<8x128xf32>
      tpu.vector_store %arg12[%c0_43, %c0_44], %54 {strides = array<i32>} : memref<8x128xf32, #tpu.memory_space<vmem>>, vector<8x128xf32>,
    } else {
    }
    %c0 = arith.constant 0 : index
    %c0_1 = arith.constant 0 : index
    %c0_2 = arith.constant 0 : index
    %3 = vector.load %arg2[%c0, %c0_1, %c0_2] : memref<1x32x16xf32, #tpu.memory_space<vmem>>, vector<1x32x16xf32>
    %4 = vector.shape_cast %3 : vector<1x32x16xf32> to vector<32x16xf32>
    %5 = arith.truncf %4 : vector<32x16xf32> to vector<32x16xbf16>
    %c0_3 = arith.constant 0 : index
    %c0_4 = arith.constant 0 : index
    %6 = vector.load %arg6[%c0_3, %c0_4] : memref<16x128xbf16, #tpu.memory_space<vmem>>, vector<16x128xbf16>
    %cst = arith.constant dense<0.000000e+00> : vector<32x128xf32>
    %7 = tpu.matmul %5, %6, %cst {dimension_numbers = #tpu.dot_dimension_numbers<[1], [0], [0], [1], [0, 0, 1, 1], [], []>} : vector<32x16xbf16>, vector<16x128xbf16>, vector<32x128xf32> -> vector<32x128xf32>
    %c0_5 = arith.constant 0 : index
    %c0_6 = arith.constant 0 : index
    %8 = vector.load %arg7[%c0_5, %c0_6] : memref<1x128xf32, #tpu.memory_space<vmem>>, vector<1x128xf32>
    %9 = vector.broadcast %8 : vector<1x128xf32> to vector<32x128xf32>
    %10 = arith.addf %7, %9 : vector<32x128xf32>
    %11 = arith.truncf %10 : vector<32x128xf32> to vector<32x128xbf16>
    %c0_7 = arith.constant 0 : index
    %c0_8 = arith.constant 0 : index
    %12 = vector.load %arg9[%c0_7, %c0_8] : memref<8x128xbf16, #tpu.memory_space<vmem>>, vector<8x128xbf16>
    %cst_9 = arith.constant dense<0.000000e+00> : vector<8x32xf32>
    %13 = tpu.matmul %12, %11, %cst_9 {dimension_numbers = #tpu.dot_dimension_numbers<[1], [1], [0], [0], [0, 0, 1, 0], [], []>} : vector<8x128xbf16>, vector<32x128xbf16>, vector<8x32xf32> -> vector<8x32xf32>
    %c0_10 = arith.constant 0 : index
    %c0_11 = arith.constant 0 : index
    %14 = vector.load %arg10[%c0_10, %c0_11] : memref<8x1xf32, #tpu.memory_space<vmem>>, vector<8x1xf32>
    %cst_12 = arith.constant dense<0xFF800000> : vector<8xf32>
    %15 = vector.multi_reduction <maximumf>, %13, %cst_12 [1] : vector<8x32xf32> to vector<8xf32>
    %16 = vector.shape_cast %15 : vector<8xf32> to vector<8x1xf32>
    %17 = arith.maximumf %14, %16 : vector<8x1xf32>
    %18 = arith.subf %14, %17 : vector<8x1xf32>
    %19 = math.exp %18 : vector<8x1xf32>
    %20 = vector.broadcast %17 : vector<8x1xf32> to vector<8x32xf32>
    %21 = arith.subf %13, %20 : vector<8x32xf32>
    %22 = math.exp %21 : vector<8x32xf32>
    %c0_13 = arith.constant 0 : index
    %c0_14 = arith.constant 0 : index
    %23 = vector.load %arg11[%c0_13, %c0_14] : memref<8x1xf32, #tpu.memory_space<vmem>>, vector<8x1xf32>
    %24 = arith.mulf %19, %23 : vector<8x1xf32>
    %cst_15 = arith.constant dense<0.000000e+00> : vector<8xf32>
    %25 = vector.multi_reduction <add>, %22, %cst_15 [1] : vector<8x32xf32> to vector<8xf32>
    %26 = vector.shape_cast %25 : vector<8xf32> to vector<8x1xf32>
    %27 = arith.addf %24, %26 : vector<8x1xf32>
    %c0_16 = arith.constant 0 : index
    %c0_17 = arith.constant 0 : index
    %28 = vector.load %arg11[%c0_16, %c0_17] : memref<8x1xf32, #tpu.memory_space<vmem>>, vector<8x1xf32>
    tpu.vector_store %arg11[%c0_16, %c0_17], %27 {strides = array<i32>} : memref<8x1xf32, #tpu.memory_space<vmem>>, vector<8x1xf32>,
    %c0_18 = arith.constant 0 : index
    %c0_19 = arith.constant 0 : index
    %29 = vector.load %arg12[%c0_18, %c0_19] : memref<8x128xf32, #tpu.memory_space<vmem>>, vector<8x128xf32>
    %30 = vector.broadcast %19 : vector<8x1xf32> to vector<8x128xf32>
    %31 = arith.mulf %30, %29 : vector<8x128xf32>
    %32 = arith.truncf %22 : vector<8x32xf32> to vector<8x32xbf16>
    %cst_20 = arith.constant dense<0.000000e+00> : vector<8x128xf32>
    %33 = tpu.matmul %32, %11, %cst_20 {dimension_numbers = #tpu.dot_dimension_numbers<[1], [0], [0], [1], [0, 0, 1, 1], [], []>} : vector<8x32xbf16>, vector<32x128xbf16>, vector<8x128xf32> -> vector<8x128xf32>
    %34 = arith.addf %31, %33 : vector<8x128xf32>
    %c0_21 = arith.constant 0 : index
    %c0_22 = arith.constant 0 : index
    %35 = vector.load %arg12[%c0_21, %c0_22] : memref<8x128xf32, #tpu.memory_space<vmem>>, vector<8x128xf32>
    tpu.vector_store %arg12[%c0_21, %c0_22], %34 {strides = array<i32>} : memref<8x128xf32, #tpu.memory_space<vmem>>, vector<8x128xf32>,
    %c0_23 = arith.constant 0 : index
    %c0_24 = arith.constant 0 : index
    %36 = vector.load %arg10[%c0_23, %c0_24] : memref<8x1xf32, #tpu.memory_space<vmem>>, vector<8x1xf32>
    tpu.vector_store %arg10[%c0_23, %c0_24], %17 {strides = array<i32>} : memref<8x1xf32, #tpu.memory_space<vmem>>, vector<8x1xf32>,
    %c1_i32 = arith.constant 1 : i32
    %37 = arith.cmpi eq, %arg1, %c1_i32 : i32
    %38 = arith.extui %37 : i1 to i32
    %c0_i32_25 = arith.constant 0 : i32
    %39 = arith.cmpi ne, %38, %c0_i32_25 : i32
    scf.if %39 {
      %c0_26 = arith.constant 0 : index
      %c0_27 = arith.constant 0 : index
      %40 = vector.load %arg11[%c0_26, %c0_27] : memref<8x1xf32, #tpu.memory_space<vmem>>, vector<8x1xf32>
      %41 = tpu.reciprocal %40 {approx = true} : vector<8x1xf32> -> vector<8x1xf32>
      %c0_28 = arith.constant 0 : index
      %c0_29 = arith.constant 0 : index
      %42 = vector.load %arg12[%c0_28, %c0_29] : memref<8x128xf32, #tpu.memory_space<vmem>>, vector<8x128xf32>
      %43 = vector.broadcast %41 : vector<8x1xf32> to vector<8x128xf32>
      %44 = arith.mulf %42, %43 : vector<8x128xf32>
      %c0_30 = arith.constant 0 : index
      %c0_31 = arith.constant 0 : index
      %c0_32 = arith.constant 0 : index
      %45 = vector.load %arg8[%c0_30, %c0_31, %c0_32] : memref<1x8x128xf32, #tpu.memory_space<vmem>>, vector<1x8x128xf32>
      %46 = vector.shape_cast %45 : vector<1x8x128xf32> to vector<8x128xf32>
      %47 = vector.shape_cast %44 : vector<8x128xf32> to vector<1x8x128xf32>
      tpu.vector_store %arg8[%c0_30, %c0_31, %c0_32], %47 {strides = array<i32>} : memref<1x8x128xf32, #tpu.memory_space<vmem>>, vector<1x8x128xf32>,
    } else {
    }
    return
  }
  func.func @transform_0(%arg0: i32, %arg1: i32) -> (i32, i32, i32) {
    %c0_i32 = arith.constant 0 : i32
    %c0_i32_0 = arith.constant 0 : i32
    return %arg0, %arg1, %c0_i32 : i32, i32, i32
  }
  func.func @transform_1(%arg0: i32, %arg1: i32) -> (i32, i32, i32) {
    %c0_i32 = arith.constant 0 : i32
    %c0_i32_0 = arith.constant 0 : i32
    %c0_i32_1 = arith.constant 0 : i32
    return %arg0, %c0_i32, %c0_i32_0 : i32, i32, i32
  }
  func.func @transform_2(%arg0: i32, %arg1: i32) -> (i32, i32) {
    %c0_i32 = arith.constant 0 : i32
    %c0_i32_0 = arith.constant 0 : i32
    %c0_i32_1 = arith.constant 0 : i32
    return %c0_i32, %c0_i32_0 : i32, i32
  }
  func.func @transform_3(%arg0: i32, %arg1: i32) -> (i32, i32) {
    %c0_i32 = arith.constant 0 : i32
    %c0_i32_0 = arith.constant 0 : i32
    %c0_i32_1 = arith.constant 0 : i32
    return %c0_i32, %c0_i32_0 : i32, i32
  }
  func.func @transform_4(%arg0: i32, %arg1: i32) -> (i32, i32) {
    %c0_i32 = arith.constant 0 : i32
    %c0_i32_0 = arith.constant 0 : i32
    %c0_i32_1 = arith.constant 0 : i32
    return %c0_i32, %c0_i32_0 : i32, i32
  }
  func.func @transform_5(%arg0: i32, %arg1: i32) -> (i32, i32) {
    %c0_i32 = arith.constant 0 : i32
    %c0_i32_0 = arith.constant 0 : i32
    %c0_i32_1 = arith.constant 0 : i32
    return %c0_i32, %c0_i32_0 : i32, i32
  }
  func.func @transform_6(%arg0: i32, %arg1: i32) -> (i32, i32, i32) {
    %c0_i32 = arith.constant 0 : i32
    %c0_i32_0 = arith.constant 0 : i32
    %c0_i32_1 = arith.constant 0 : i32
    return %arg0, %c0_i32, %c0_i32_0 : i32, i32, i32
  }
}

</mosaic_0001>

<bundles_post_ra>
// kernel: tpu_custom_call.1
= control target key start
LH: loop header
LB: loop body
LE: loop exit
PB: predicated region body
PF: predicated region fallthrough
CT: control target
= control target key end

     0   :  { %11 = vsyncpa [#allocation7], 0  ;;  %s1155_s0 = inlined_call_operand.vmem [shape: f32[2,64,16], index: 0, kind: input, shape index: {}]   ;;  %s1156_s1 = inlined_call_operand.vmem [shape: f32[2,8,32], index: 1, kind: input, shape index: {}]   ;;  %s1157_s2 = inlined_call_operand.vmem [shape: bf16[32,128], index: 2, kind: input, shape index: {}]   ;;  %s1158_s3 = inlined_call_operand.vmem [shape: f32[1,128], index: 3, kind: input, shape index: {}]   ;;  %s1159_s4 = inlined_call_operand.vmem [shape: bf16[16,128], index: 4, kind: input, shape index: {}]   ;;  %s1160_s5 = inlined_call_operand.vmem [shape: f32[1,128], index: 5, kind: input, shape index: {}]   ;;  %s1161_s6 = inlined_call_operand.hbm [shape: f32[2,8,128], index: 6, kind: output, shape index: {}]  }
   0x1   :  { %13 = vsyncpa [#allocation7 + $0x1], 0  ;;  %s986_s21 = smov 0   ;;  %s988_s22 = smov 0  }
   0x2   :  { %s990_s23 = smov 0   ;;  %s992_s24 = smov 0  }
   0x3   :  { %s994_s25 = smov 0   ;;  %s996_s26 = smov 0  }
   0x4   :  { %s998_s27 = smov 0   ;;  %s1000_s28 = smov 0  }
   0x5 LB: > { %1166 = sst [smem:[#allocation9_spill]] %s933_s26  ;;  %s690_s29 = sadd.s32 4294967295, %s941_s28   ;;  %s941_s28 = sphi %s1000_s28, %s19_s28   ;;  %s937_s27 = sphi %s998_s27, %s1176_s27   ;;  %s933_s26 = sphi %s996_s26, %s1175_s26   ;;  %s929_s25 = sphi %s994_s25, %s1174_s25   ;;  %s925_s24 = sphi %s992_s24, %s1173_s24   ;;  %s921_s23 = sphi %s990_s23, %s1179_s23   ;;  %s917_s22 = sphi %s988_s22, %s1178_s22   ;;  %s913_s21 = sphi %s986_s21, %s1177_s21  }
   0x6   : > { %1167 = sst [smem:[#allocation10_spill]] %s937_s27  ;;  %s691_s30 = sadd.s32 4294967294, %s941_s28  }
   0x7   : > { %s28_s7 = sadd.s32 1, %s933_s26  ;;  %s31_s8 = sadd.s32 1, %s937_s27 }
   0x8   : > { %p29_p0 = scmp.ge.s32.totalorder %s28_s7, 2  ;;  %p186_p1 = scmp.ne.s32.totalorder %s921_s23, %s917_s22 }
   0x9   : > { %p187_p2 = scmp.eq.s32.totalorder %s690_s29, 3  ;;  %p192_p4 = scmp.ne.s32.totalorder %s917_s22, %s913_s21 }
   0xa   : > { %s1181_s7 = smov (%p29_p0, %s28_s7), 0  ;;  %s1183_s8 = smov (!%p29_p0, %s31_s8), %s937_s27 }
   0xb   : > { %1168 = sst [smem:[#allocation11_spill]] %s1181_s7  ;;  %p1035_p3 = por %p187_p2, %p186_p1 }
   0xc   : > { %p33_p5 = scmp.ge.s32.totalorder %s1183_s8, 2  ;;  %p193_p6 = scmp.eq.s32.totalorder %s691_s30, 3 }
   0xd   : > { %p694_p7 = scmp.ge.s32.totalorder %s941_s28, 1  ;;  %p243_p8 = scmp.lt.s32.totalorder %s941_s28, 5 }
   0xe   : > { %s1185_s8 = smov (%p33_p5, %s1183_s8), 0  ;;  %p1045_p9 = por %p193_p6, %p192_p4 }
   0xf   : > { %1170 = sst [smem:[#allocation12_spill]] %s1185_s8  ;;  %p244_p10 = pnand %p694_p7, %p243_p8 }
  0x10   : > { %s173_s11 = ssub.s32 %s937_s27, %s1185_s8  ;;  %s176_s12 = sadd.s32 1, %s921_s23 }
  0x11   : > { %p174_p11 = scmp.eq.s32.totalorder %s173_s11, 0  ;;  %247 = sbr.rel (%p244_p10) target bundleno = 1311 (0x51f), region = 44 }
  0x12   : > { %s1164_s14 = sand.u32 (!%p244_p10), 1, %s917_s22   ;;  %s696_s15 = sshll.u32 (!%p244_p10), %s925_s24, 2 }
  0x13   : > { %s1053_s13 = scalar_select %p174_p11, %s921_s23, %s176_s12  }
  0x14   : > { %s1059_s16 = sshll.u32 (!%p244_p10), %s1164_s14, 3  ;;  %p282_p12 = scmp.lt.s32.totalorder (!%p244_p10), %s929_s25, 1 }
  0x15   : > { %p284_p13 = scmp.lt.s32.totalorder (!%p244_p10), %s696_s15, 7  ;;  %s280_s27 = scalar_lea.vmem (!%p244_p10), [#allocation6], %s1059_s16 }
  0x16   : > { %p700_p0 = scmp.ne.s32.totalorder (!%p244_p10), %s925_s24, 0 }
  0x18   : > { %s283_s17 = scalar_select %p282_p12, %s929_s25, 1 }
  0x19   : > { %s1187_s15 = smov (!%p284_p13, %s696_s15), 7  ;;  %299 = sbr.rel (%p700_p0) target bundleno = 252 (0xfc), region = 48 }
  0x1a   : > { %s697_s18 = sshll.u32 %s283_s17, 3  ;;  %vm371_vm0 = vcmask (!%p700_p0), 7168   ;;  %v835_v0 = vld [vmem:[%s1157_s2] sm:$0xff] (!%p700_p0)   ;;  %v943_v1 = vmov (!%p700_p0), 0.0   ;;  %v944_v2 = vmov (!%p700_p0), -inf   ;;  %v836_v3 = vld [vmem:[%s1157_s2 + $0x8] sm:$0xff] (!%p700_p0)  }
  0x1b   : > { %s287_s19 = sadd.s32 %s697_s18, %s1187_s15  ;;  %s294_s30 = scalar_lea.vmem %s1156_s1, %s697_s18  ;;  %727 = vmatprep.subr.bf16.mxu0 (!%p700_p0), %v943_v1  ;;  %372 = vst.msk [vmem:[#allocation3] sm:$0xff] (!%p700_p0), %vm371_vm0, %v944_v2  ;;  %373 = vst.msk [vmem:[#allocation4] sm:$0xff] (!%p700_p0), %vm371_vm0, %v943_v1  ;;  %vm945_vm1 = vmmov (!%p700_p0), 0   ;;  %vm325_vm2 = vcmask (!%p700_p0), 261120   ;;  %v701_v6 = vld [vmem:[%s1158_s3] ss:$0 sm:$0xff] (!%p700_p0) }
  0x1c   : > { %s698_s11 = sshll.u32 %s287_s19, 3  ;;  %374 = vst [vmem:[#allocation5] sm:$0xff] (!%p700_p0), %v943_v1  ;;  %728 = vmatpush3.bf16.msra.mxu0 (!%p700_p0), %v835_v0  ;;  %v300_v4 = vld [vmem:[%s294_s30] sm:$0xff] (!%p700_p0)  ;;  %731 = vmatprep.mubr.msk.bf16.mxu0 (!%p700_p0), %vm945_vm1, %v943_v1 }
  0x1d   : > { %s1069_s7 = scalar_lea.vmem %s1155_s0, %s698_s11  ;;  %729 = vmatprep.subr.bf16.mxu0 (!%p700_p0), %v943_v1  ;;  %v301_v5 = vpack.c.bf16 (!%p700_p0), %v300_v4, %v300_v4 }
  0x20   : > { %730 = vmatpush3.bf16.msra.mxu0 %v836_v3 }
  0x23   : > { %732 = vmatmul.mubr.msk.bf16.vlgmr.msra.gmra.mrb[0].mxu0 %vm325_vm2, %v301_v5 }
  0xf6   : > { %v363_v7 = vpop.f32.mrb[0].mxu0 }
  0xf7   : > { %v364_v8 = vadd.f32 %v701_v6, %v363_v7  ;;  %v733_v9 = vpop.f32.mrb[1].mxu0 }
  0xf8   : > { %v366_v10 = vpop.f32.mrb[2].mxu0 }
  0xf9   : > { %v369_v11 = vpack.c.bf16 %v364_v8, %v364_v8  ;;  %v734_v12 = vpop.f32.mrb[3].mxu0 }
  0xfb   : > { %370 = vst [vmem:[#allocation2] sm:$0xf] %v369_v11 }
  0xfc PF: > { %v839_v13 = vld [vmem:[%s1159_s4] sm:$0xff]   ;;  %v376_v15 = vld [vmem:[%s1069_s7 + $0x8] sm:$0xff]  ;;  %vm396_vm3 = vcmask 130048   ;;  %v377_v16 = vld [vmem:[%s1069_s7 + $0x10] sm:$0xff]  ;;  %v946_v20 = vmov 0.0   ;;  %vm947_vm4 = vmmov 0  }
  0xfd   : > { %v375_v14 = vld [vmem:[%s1069_s7] sm:$0xff]  ;;  %735 = vmatprep.subr.bf16.mxu0 %v839_v13  ;;  %v378_v18 = vld [vmem:[%s1069_s7 + $0x18] sm:$0xff]  ;;  %741 = vmatprep.subr.bf16.mxu1 %v946_v20  ;;  %vm496_vm5 = vcmask 261120   ;;  %v948_v38 = vmov 0   ;;  %vm518_vm6 = vcmask 7168   ;;  %p710_p1 = scmp.ne.s32.totalorder %s925_s24, 1 }
  0xfe   : > { %v379_v17 = vpack.c.bf16 %v376_v15, %v375_v14  ;;  %736 = vmatpush3.bf16.msra.mxu0 %v839_v13  ;;  %v380_v19 = vpack.c.bf16 %v378_v18, %v377_v16  ;;  %745 = vmatprep.mubr.msk.bf16.mxu1 %vm947_vm4, %v946_v20  ;;  %v705_v22 = vld [vmem:[%s1160_s5] ss:$0 sm:$0xff]  ;;  %v495_v39 = vld [vmem:[#allocation3] sm:$0xff]  ;;  %v512_v51 = vld [vmem:[#allocation4] sm:$0xff]  ;;  %v949_v0 = vmov (!%p710_p1), 0  }
  0xff   : > { %749 = vmatprep.subr.bf16.mxu0 %v946_v20  ;;  %837 = vset.pattern.permute.xlu0 %v948_v38  ;;  %v520_v55 = vld [vmem:[#allocation5] sm:$0xff] }
 0x100   : > { %737 = vmatprep.mubr.msk.bf16.mxu0 %vm396_vm3, %v379_v17  ;;  %838 = vset.pattern.permute.xlu1 %v948_v38 }
 0x101   : > { %738 = vmatmul.mubr.msk.bf16.vlgmr.msra.gmra.mrb[0].mxu0 %vm396_vm3, %v380_v19 }
 0x102   : > { %753 = vmatprep.mubr.msk.bf16.mxu0 %vm947_vm4, %v946_v20  ;;  %v454_v32 = vld [vmem:[#allocation2] sm:$0xf] }
 0x1d4   : > { %v739_v21 = vpop.f32.mrb[0].mxu0 }
 0x1d5   : > { %v437_v23 = vpop.f32.mrb[1].mxu0  ;;  %v446_v25 = vadd.f32 %v739_v21, %v705_v22 }
 0x1d6   : > { %v740_v24 = vpop.f32.mrb[2].mxu0  ;;  %v438_v28 = vadd.f32 %v705_v22, %v437_v23 }
 0x1d7   : > { %v449_v26 = vadd.f32 %v740_v24, %v705_v22  ;;  %v440_v27 = vpop.f32.mrb[3].mxu0 }
 0x1d8   : > { %v441_v29 = vadd.f32 %v705_v22, %v440_v27 }
 0x1d9   : > { %v453_v30 = vpack.c.bf16 %v449_v26, %v446_v25 }
 0x1da   : > { %v452_v31 = vpack.c.bf16 %v441_v29, %v438_v28 }
 0x1dc   : > { %742 = vmatpush3.bf16.xpose.msra.mxu1 %v452_v31  ;;  %750 = vmatpush3.bf16.msra.mxu0 %v452_v31 }
 0x1dd   : > { %751 = vmatprep.subr.bf16.mxu0 %v946_v20  ;;  %743 = vmatprep.subr.bf16.mxu1 %v946_v20 }
 0x1e0   : > { %752 = vmatpush3.bf16.msra.mxu0 %v453_v30 }
 0x1e4   : > { %744 = vmatpush3.bf16.xpose.msra.mxu1 %v453_v30 }
 0x1eb   : > { %746 = vmatmul.mubr.bf16.vlgmr.msra.gmra.mrb[0].mxu1 %v454_v32 }
 0x2be   : > { %v489_v33 = vpop.f32.mrb[0].mxu1 }
 0x2bf   : > { %v747_v34 = vpop.f32.mrb[1].mxu1  ;;  %v497_v35 = vsel %vm496_vm5, %v489_v33, -inf }
 0x2c0   : > { %498 = vmax.xlane.f32.xlu0 %v497_v35  ;;  %v492_v36 = vpop.f32.mrb[2].mxu1 }
 0x2c1   : > { %v748_v37 = vpop.f32.mrb[3].mxu1 }
 0x34d   : > { %v499_v40 = vpop.xlane.xlu0 %498 }
 0x34e   : > { %v500_v41 = vmax.f32 %v495_v39, %v499_v40 }
 0x350   : > { %v501_v42 = vsub.f32 %v495_v39, %v500_v41  ;;  %573 = vst.msk [vmem:[#allocation3] sm:$0xff] %vm518_vm6, %v500_v41  ;;  %506 = vperm.xlu0 %837, %v500_v41  }
 0x352   : > { %v502_v49 = vmul.f32 1.442695, %v501_v42 }
 0x354   : > { %844 = vset.pattern.permute.xlu0 (!%p710_p1), %v949_v0 }
 0x3cf   : > { %v507_v43 = vpop.permute.xlu0 %506 }
 0x3d0   : > { %v509_v44 = vsub.f32 %v489_v33, %v507_v43 }
 0x3d2   : > { %v510_v45 = vmul.f32 1.442695, %v509_v44 }
 0x3d4   : > { %840 = vpow2.f32 %v510_v45 }
 0x3d5   : > { %842 = vpow2.f32 %v502_v49 }
 0x3de   : > { %v841_v46 = vpop.eup %840 }
 0x3df   : > { %v514_v47 = vsel %vm496_vm5, %v841_v46, 0.0  ;;  %v527_v48 = vpack.c.bf16 %v841_v46, %v841_v46  ;;  %v843_v50 = vpop.eup %842 }
 0x3e0   : > { %515 = vadd.xlane.f32.xlu1 %v514_v47  ;;  %v513_v52 = vmul.f32 %v843_v50, %v512_v51 }
 0x3e1   : > { %754 = vmatmul.mubr.msk.bf16.vlgmr.msra.gmra.mrb[4].mxu0 %vm496_vm5, %v527_v48 }
 0x3f1   : > { %523 = vperm.xlu1 %838, %v843_v50  }
 0x46d   : > { %v516_v53 = vpop.xlane.xlu1 %515 }
 0x46e   : > { %v517_v54 = vadd.f32 %v516_v53, %v513_v52 }
 0x470   : > { %519 = vst.msk [vmem:[#allocation4] sm:$0xff] %vm518_vm6, %v517_v54 }
 0x471   : > { %v524_v56 = vpop.permute.xlu1 %523 }
 0x472   : > { %v526_v57 = vmul.f32 %v524_v56, %v520_v55 }
 0x477   : > { %v578_v63 = vld [vmem:[#allocation4] sm:$0xff] (!%p710_p1) }
 0x478   : > { %845 = vrcp.f32 (!%p710_p1), %v578_v63 }
 0x482   : > { %v846_v1 = vpop.eup (!%p710_p1), %845 }
 0x483   : > { %583 = vperm.xlu0 (!%p710_p1), %844, %v846_v1  }
 0x4b1   : > { %577 = sbr.rel (%p710_p1) target bundleno = 1286 (0x506), region = 52 }
 0x4b4   : > { %v565_v58 = vpop.f32.mrb[4].mxu0 }
 0x4b5   : > { %v571_v59 = vadd.f32 %v565_v58, %v526_v57  ;;  %v755_v60 = vpop.f32.mrb[5].mxu0 }
 0x4b6   : > { %v568_v61 = vpop.f32.mrb[6].mxu0 }
 0x4b7   : > { %572 = vst [vmem:[#allocation5] sm:$0xff] %v571_v59  ;;  %v756_v62 = vpop.f32.mrb[7].mxu0 }
 0x4be   : > { %v580_v2 = vld [vmem:[#allocation5] sm:$0xff] }
 0x502   : > { %v584_v3 = vpop.permute.xlu0 %583 }
 0x503   : > { %v586_v4 = vmul.f32 %v584_v3, %v580_v2 }
 0x505   : > { %587 = vst [vmem:[%s280_s27] sm:$0xff] %v586_v4 }
 0x506 PF: > { %s712_s7 = sshll.u32 %s929_s25, 7  ;;  %s602_s11 = sshll.u32 %s280_s27, 4  ;;  %s603_s11 = int_to_ptr.vmem [resolvable:$true] %s602_s11 }
 0x507   : > { %s1104_s30 = scalar_lea.hbm %s1161_s6, %s712_s7  ;;  %s1172_s12 = sand.u32 1, %s917_s22  }
 0x508   : > { %s589_s15 = scalar_lea.sflag [#allocation7], %s1172_s12  ;;  %s847_s8 = scalar_lea.vmem %s603_s11, 128 }
 0x509   : > { %p848_p2 = scmp.ne.s32.totalorder %s603_s11, %s847_s8  ;;  %s950_s26 = smov [#allocation6]  }
 0x50a   : > { %s851_s14 = sshll.u32 %s950_s26, 4  ;;  %s852_s14 = int_to_ptr.vmem [resolvable:$false] %s851_s14 }
 0x50b   : > { %p849_p4 = pnand %p848_p2, %p1035_p3  ;;  %s853_s17 = scalar_lea.vmem %s852_s14, 256 }
 0x50c   : > { %p854_p6 = scmp.lt.s32.totalorder %s603_s11, %s852_s14  ;;  %p855_p7 = scmp.lt.s32.totalorder %s853_s17, %s847_s8 }
 0x50d   : > { %p850_p5 = pneg %p849_p4 }
 0x50e   : > { %p856_p8 = por %p855_p7, %p854_p6 }
 0x510   : > { %p857_p10 = pnand %p856_p8, %p850_p5 }
 0x512   : > { %860 = shalt.err (!%p857_p10)
}
 0x513   : > { %s861_s25 = scalar_lea.hbm %s1104_s30, 128  ;;  %s865_s18 = scalar_lea.hbm %s1161_s6, 256 }
 0x514   : > { %p862_p11 = scmp.ne.s32.totalorder %s1104_s30, %s861_s25  ;;  %p866_p0 = scmp.lt.u32.totalorder %s1104_s30, %s1161_s6 }
 0x515   : > { %p867_p1 = scmp.lt.u32.totalorder %s865_s18, %s861_s25  ;;  %p869_p4 = scmp.lt.u32.totalorder %s861_s25, %s1104_s30 }
 0x516   : > { %p863_p12 = pnand %p862_p11, %p1035_p3 }
 0x517   : > { %p868_p2 = por %p867_p1, %p866_p0 }
 0x518   : > { %p864_p13 = pneg %p863_p12 }
 0x519   : > { %p870_p5 = por %p869_p4, %p868_p2 }
 0x51b   : > { %p871_p6 = pnand %p870_p5, %p864_p13 }
 0x51d   : > { %874 = shalt.err (!%p871_p6)
}
 0x51e   : > { %757 = dma.vmem_to_hbm [thread:$0]  (%p1035_p3), %s603_s11, 128, %s1104_s30, %s589_s15  }
 0x51f PF: > { %p763_p7 = scmp.ge.s32.totalorder %s941_s28, 2  ;;  %s614_s7 = sand.u32 1, %s913_s21  }
 0x520   : > { %s615_s24 = scalar_lea.sflag [#allocation7], %s614_s7 }
 0x521   : > { %p760_p8 = pnand %p763_p7, %p1045_p9 }
 0x523   : > { %908 = dma.done.wait (!%p760_p8), %s615_s24, 128  }
 0x524   : > { %910 = vsyncadd (!%p760_p8), %s615_s24, 4294967168  ;;  %s19_s28 = sadd.s32 1, %s941_s28   ;;  %s1173_s24 = sld [smem:[#allocation9_spill]] }
 0x525   : > { %p16_p10 = scmp.ge.s32.totalorder %s19_s28, 6   ;;  %s1174_s25 = sld [smem:[#allocation10_spill]] }
 0x526   : > { %s1175_s26 = sld [smem:[#allocation11_spill]]  ;;  %s1176_s27 = sld [smem:[#allocation12_spill]] }
 0x527   : > { %s1177_s21 = smov %s917_s22  ;;  %s1178_s22 = smov %s921_s23 }
 0x528   : > { %s1179_s23 = smov %s1053_s13  ;;  %18 = sbr.rel (!%p16_p10) target bundleno = 5 (0x5), region = 90 }
 0x52f   :  { %620 = vsyncpa [#allocation7], 1 }
 0x530   :  { %622 = vsyncpa [#allocation7 + $0x1], 1 }

</bundles_post_ra>
